<compile_context>
chip_gen: v6e
topology: v6e:2x2x1
jax: 0.10.0
libtpu: 0.0.40
codegen_flags: <defaults>
</compile_context>

<pallas_src>
import functools

import jax
import jax.numpy as jnp
from jax.experimental import pallas as pl
from jax.experimental.pallas import tpu as pltpu


_LANES = 128
_SUBLANES = 8


def _spatial_softmax_kernel(x_ref, w_ref, o_ref, *, inv_temperature):
    # x_ref: (TM, HWp)   feature rows (pad columns hold a large negative value)
    # w_ref: (HWp, 128)  packed weights: col0=pos_x, col1=pos_y, col2=ones
    #                    (all zero on pad rows), remaining columns zero
    # o_ref: (TM, 128)   lane-dense output slab; col0=E[x], col1=E[y]
    x = x_ref[...].astype(jnp.float32) * inv_temperature

    # Numerically stable exp; the final ratio sum(w*e)/sum(e) is invariant
    # to the max shift, so no full softmax tensor is ever materialized.
    m = jnp.max(x, axis=-1, keepdims=True)
    e = jnp.exp(x - m)

    # One MXU matmul replaces three cross-lane (XLU) reductions:
    #   r[:, 0] = sum(e * pos_x), r[:, 1] = sum(e * pos_y), r[:, 2] = sum(e)
    r = jnp.dot(e, w_ref[...], preferred_element_type=jnp.float32)  # (TM, 128)

    s = r[:, 2:3]                     # (TM, 1) softmax denominator
    inv_s = pl.reciprocal(s)          # exact; only TM values of work
    o_ref[...] = (r * inv_s).astype(o_ref.dtype)


def spatial_softmax(feature, pos_x, pos_y, *, temperature=1.0,
                    block_rows=None, vmem_budget_bytes=20 * 1024 * 1024):
    """feature: (N, C, H, W) NCHW. Returns expected_xy: (N*C, 2) float32."""
    N, C, H, W = feature.shape
    R, HW = N * C, H * W
    in_itemsize = jnp.dtype(feature.dtype).itemsize

    x = feature.reshape(R, HW)

    # Pad the softmax axis up to a full lane multiple (128). Feature pad
    # columns get a huge negative value (exp -> 0); weight pad rows are zero,
    # so pad lanes never contribute to any of the three sums.
    HWp = ((HW + _LANES - 1) // _LANES) * _LANES
    if HWp != HW:
        x = jnp.pad(x, ((0, 0), (0, HWp - HW)), constant_values=-1e30)

    # Single packed reduction-weight constant (instead of two (1, HW) inputs).
    w = jnp.zeros((HWp, _LANES), jnp.float32)
    w = w.at[:HW, 0].set(pos_x.reshape(HW).astype(jnp.float32))
    w = w.at[:HW, 1].set(pos_y.reshape(HW).astype(jnp.float32))
    w = w.at[:HW, 2].set(1.0)

    # Choose the biggest row tile that fits the VMEM budget:
    #   2x double-buffered input tile + f32 `e` intermediate + output slab,
    # leaving room for the (double-buffered) packed weight constant.
    if block_rows is None:
        w_bytes = 2 * HWp * _LANES * 4
        per_row = HWp * (2 * in_itemsize + 4) + 2 * _LANES * 4
        budget = max(vmem_budget_bytes - w_bytes, 1 << 20)
        block_rows = max(_SUBLANES,
                         min(1024, (budget // per_row) // _SUBLANES * _SUBLANES))
    # Never make the tile bigger than the (sublane-rounded) row count.
    block_rows = min(int(block_rows),
                     ((R + _SUBLANES - 1) // _SUBLANES) * _SUBLANES)
    block_rows = max(_SUBLANES, (block_rows // _SUBLANES) * _SUBLANES)

    # Pad rows instead of asserting divisibility; pad rows are dropped below.
    R_pad = ((R + block_rows - 1) // block_rows) * block_rows
    if R_pad != R:
        x = jnp.pad(x, ((0, R_pad - R), (0, 0)))

    kernel = functools.partial(_spatial_softmax_kernel,
                               inv_temperature=1.0 / float(temperature))

    out = pl.pallas_call(
        kernel,
        out_shape=jax.ShapeDtypeStruct((R_pad, _LANES), jnp.float32),
        grid_spec=pltpu.PrefetchScalarGridSpec(
            num_scalar_prefetch=0,
            grid=(R_pad // block_rows,),
            in_specs=[
                pl.BlockSpec((block_rows, HWp), lambda i: (i, 0)),
                pl.BlockSpec((HWp, _LANES), lambda i: (0, 0)),
            ],
            out_specs=pl.BlockSpec((block_rows, _LANES), lambda i: (i, 0)),
        ),
        compiler_params=pltpu.CompilerParams(
            dimension_semantics=("parallel",),
            vmem_limit_bytes=32 * 1024 * 1024,
        ),
    )(x, w)

    # Lane-dense (R_pad, 128) slab -> (N*C, 2) [expected_x, expected_y].
    return out[:R, :2]


def make_pos_buffers(height, width):
    # Matches np.meshgrid default ('xy' indexing) used in the torch module:
    #   pos_x, pos_y = np.meshgrid(linspace(-1,1,H), linspace(-1,1,W))
    # (reproduced bug-for-bug, including the H/W quirk when H != W).
    pos_x, pos_y = jnp.meshgrid(
        jnp.linspace(-1.0, 1.0, height), jnp.linspace(-1.0, 1.0, width)
    )
    pos_x = pos_x.reshape(height * width).astype(jnp.float32)
    pos_y = pos_y.reshape(height * width).astype(jnp.float32)
    return pos_x, pos_y


def reference(feature, pos_x, pos_y, temperature=1.0):
    N, C, H, W = feature.shape
    x = feature.reshape(-1, H * W).astype(jnp.float32) / temperature
    p = jax.nn.softmax(x, axis=-1)
    ex = jnp.sum(pos_x[None, :] * p, axis=1, keepdims=True)
    ey = jnp.sum(pos_y[None, :] * p, axis=1, keepdims=True)
    return jnp.concatenate([ex, ey], axis=1)


if __name__ == "__main__":
    batch, channel, height, width = 2, 4, 16, 16
    temperature = 1.0  # module default (temperature=None -> 1.0)

    key = jax.random.PRNGKey(0)
    feature = jax.random.normal(key, (batch, channel, height, width),
                                dtype=jnp.float32)

    pos_x, pos_y = make_pos_buffers(height, width)

    out = spatial_softmax(feature, pos_x, pos_y, temperature=temperature)
    out = jax.block_until_ready(out)

    ref = reference(feature, pos_x, pos_y, temperature)
    assert out.shape == (batch * channel, 2), out.shape
    assert jnp.allclose(out, ref, atol=1e-5, rtol=1e-5), (out, ref)

    print("KERNEL_OK")
</pallas_src>

<mosaic_0001>
module attributes {stable_mosaic.version = 11 : i64} {
  func.func @_spatial_softmax_kernel(%arg0: i32, %arg1: memref<8x256xf32, #tpu.memory_space<vmem>>, %arg2: memref<256x128xf32, #tpu.memory_space<vmem>>, %arg3: memref<8x128xf32, #tpu.memory_space<vmem>>) attributes {dimension_semantics = [#tpu.dimension_semantics<parallel>], iteration_bounds = array<i64: 1>, scalar_prefetch = 0 : i64, scratch_operands = 0 : i64, tpu.core_type = #tpu.core_type<tc>, window_params = [{transform_indices = @transform_0, window_bounds = array<i64: 8, 256>}, {pipeline_mode = #tpu.pipeline_mode<synchronous>, transform_indices = @transform_1, window_bounds = array<i64: 256, 128>}, {transform_indices = @transform_2, window_bounds = array<i64: 8, 128>}]} {
    %c0 = arith.constant 0 : index
    %c0_0 = arith.constant 0 : index
    %0 = vector.load %arg1[%c0, %c0_0] : memref<8x256xf32, #tpu.memory_space<vmem>>, vector<8x256xf32>
    %cst = arith.constant 1.000000e+00 : f32
    %1 = vector.broadcast %cst : f32 to vector<8x256xf32>
    %2 = arith.mulf %0, %1 : vector<8x256xf32>
    %cst_1 = arith.constant dense<0xFF800000> : vector<8xf32>
    %3 = vector.multi_reduction <maximumf>, %2, %cst_1 [1] : vector<8x256xf32> to vector<8xf32>
    %4 = vector.shape_cast %3 : vector<8xf32> to vector<8x1xf32>
    %5 = vector.broadcast %4 : vector<8x1xf32> to vector<8x256xf32>
    %6 = arith.subf %2, %5 : vector<8x256xf32>
    %7 = math.exp %6 : vector<8x256xf32>
    %c0_2 = arith.constant 0 : index
    %c0_3 = arith.constant 0 : index
    %8 = vector.load %arg2[%c0_2, %c0_3] : memref<256x128xf32, #tpu.memory_space<vmem>>, vector<256x128xf32>
    %cst_4 = arith.constant dense<0.000000e+00> : vector<8x128xf32>
    %9 = tpu.matmul %7, %8, %cst_4 {dimension_numbers = #tpu.dot_dimension_numbers<[1], [0], [0], [1], [0, 0, 1, 1], [], []>} : vector<8x256xf32>, vector<256x128xf32>, vector<8x128xf32> -> vector<8x128xf32>
    %10 = vector.extract_strided_slice %9 {offsets = [0, 2], sizes = [8, 1], strides = [1, 1]} : vector<8x128xf32> to vector<8x1xf32>
    %11 = tpu.reciprocal %10 : vector<8x1xf32> -> vector<8x1xf32>
    %12 = vector.broadcast %11 : vector<8x1xf32> to vector<8x128xf32>
    %13 = arith.mulf %9, %12 : vector<8x128xf32>
    %c0_5 = arith.constant 0 : index
    %c0_6 = arith.constant 0 : index
    %14 = vector.load %arg3[%c0_5, %c0_6] : memref<8x128xf32, #tpu.memory_space<vmem>>, vector<8x128xf32>
    tpu.vector_store %arg3[%c0_5, %c0_6], %13 {strides = array<i32>} : memref<8x128xf32, #tpu.memory_space<vmem>>, vector<8x128xf32>,
    return
  }
  func.func @transform_0(%arg0: i32) -> (i32, i32) {
    %c0_i32 = arith.constant 0 : i32
    %c0_i32_0 = arith.constant 0 : i32
    return %arg0, %c0_i32 : i32, i32
  }
  func.func @transform_1(%arg0: i32) -> (i32, i32) {
    %c0_i32 = arith.constant 0 : i32
    %c0_i32_0 = arith.constant 0 : i32
    %c0_i32_1 = arith.constant 0 : i32
    return %c0_i32, %c0_i32_0 : i32, i32
  }
  func.func @transform_2(%arg0: i32) -> (i32, i32) {
    %c0_i32 = arith.constant 0 : i32
    %c0_i32_0 = arith.constant 0 : i32
    return %arg0, %c0_i32 : i32, i32
  }
}

</mosaic_0001>

<bundles_post_ra>
// kernel: tpu_custom_call.1
= control target key start
LH: loop header
LB: loop body
LE: loop exit
PB: predicated region body
PF: predicated region fallthrough
CT: control target
= control target key end

     0   :  { %7 = vsyncpa [#allocation3], 0  ;;  %s327_s0 = inlined_call_operand.hbm [shape: f32[8,256], index: 0, kind: input, shape index: {}]   ;;  %s328_s1 = inlined_call_operand.hbm [shape: f32[256,128], index: 1, kind: input, shape index: {}]   ;;  %s329_s2 = inlined_call_operand.hbm [shape: f32[8,128], index: 2, kind: output, shape index: {}]  }
   0x1   :  { %8 = vsyncpa [#allocation6], 0 }
   0x2   :  { %9 = vsyncpa [#allocation4], 0  ;;  %s289_s9 = smov [#allocation2]   ;;  %s290_s11 = smov [#allocation5]  }
   0x3   :  { %s16_s10 = sshll.u32 %s289_s9, 4  ;;  %s25_s12 = sshll.u32 %s290_s11, 4  ;;  %s17_s10 = int_to_ptr.vmem [resolvable:$true] %s16_s10  ;;  %s26_s12 = int_to_ptr.vmem [resolvable:$true] %s25_s12 }
   0x4   :  { %s231_s13 = scalar_lea.vmem %s17_s10, 256  ;;  %p236_p1 = scmp.lt.s32.totalorder %s17_s10, %s17_s10 }
   0x5   :  { %p232_p0 = scmp.ne.s32.totalorder %s17_s10, %s231_s13  ;;  %p237_p2 = scmp.lt.s32.totalorder %s231_s13, %s231_s13 }
   0x7   :  { %p238_p3 = por %p237_p2, %p236_p1 }
   0x9   :  { %p239_p4 = pnand %p238_p3, %p232_p0 }
   0xb   :  { %242 = shalt.err (!%p239_p4)
}
   0xc   :  { %19 = dma.hbm_to_vmem [thread:$0]  %s327_s0, 256, %s17_s10, [#allocation3]  }
   0xd   :  { %s251_s16 = scalar_lea.vmem %s26_s12, 4096  ;;  %p256_p6 = scmp.lt.s32.totalorder %s26_s12, %s26_s12 }
   0xe   :  { %p252_p5 = scmp.ne.s32.totalorder %s26_s12, %s251_s16  ;;  %p257_p7 = scmp.lt.s32.totalorder %s251_s16, %s251_s16 }
  0x10   :  { %p258_p8 = por %p257_p7, %p256_p6 }
  0x12   :  { %p259_p9 = pnand %p258_p8, %p252_p5 }
  0x14   :  { %262 = shalt.err (!%p259_p9)
}
  0x15   :  { %s291_s17 = smov 128   ;;  %s292_s18 = smov 8  }
  0x16   :  { %31 = dma.hbm_to_vmem [thread:$0]  %s328_s1, 4096, %s26_s12, [#allocation6], %s291_s17, %s291_s17, %s292_s18  }
  0x17   :  { %283 = dma.done.wait [#allocation3], 256  }
  0x18   :  { %284 = vsyncadd [#allocation3], 4294967040 }
  0x19   :  { %285 = dma.done.wait [#allocation6], 4096  }
  0x1a   :  { %286 = vsyncadd [#allocation6], 4294963200  ;;  %v316_v0 = vld [vmem:[#allocation2] sm:$0xff]  ;;  %v318_v1 = vld [vmem:[#allocation2 + $0x8] sm:$0xff]  ;;  %v293_v42 = vmov 2   ;;  %s294_s0 = smov [#allocation7]  }
  0x1b   :  { %v80_v2 = vld [vmem:[#allocation5 + $0xf8] sm:$0xff]  ;;  %v40_v3 = vmax.f32 %v316_v0, %v318_v1  ;;  %v79_v5 = vld [vmem:[#allocation5 + $0xf0] sm:$0xff]  ;;  %v78_v7 = vld [vmem:[#allocation5 + $0xe8] sm:$0xff]  ;;  %216 = vset.pattern.permute.xlu0 %v293_v42  ;;  %s165_s1 = sshll.u32 %s294_s0, 4  ;;  %s166_s1 = int_to_ptr.vmem [resolvable:$true] %s165_s1 }
  0x1c   :  { %175 = vmatprep.subr.mxu0 %v80_v2  ;;  %v64_v4 = vld [vmem:[#allocation5 + $0x78] sm:$0xff]  ;;  %v63_v6 = vld [vmem:[#allocation5 + $0x70] sm:$0xff]  ;;  %v62_v8 = vld [vmem:[#allocation5 + $0x68] sm:$0xff]  ;;  %s263_s21 = scalar_lea.vmem %s166_s1, 128  ;;  %p268_p11 = scmp.lt.s32.totalorder %s166_s1, %s166_s1 }
  0x1d   :  { %176 = vmatpush3.msra.mxu0 %v64_v4  ;;  %41 = vmax.xlane.f32.xlu0 %v40_v3  ;;  %v77_v9 = vld [vmem:[#allocation5 + $0xe0] sm:$0xff]  ;;  %v76_v11 = vld [vmem:[#allocation5 + $0xd8] sm:$0xff]  ;;  %v75_v13 = vld [vmem:[#allocation5 + $0xd0] sm:$0xff]  ;;  %p264_p10 = scmp.ne.s32.totalorder %s166_s1, %s263_s21  ;;  %p269_p12 = scmp.lt.s32.totalorder %s263_s21, %s263_s21 }
  0x1e   :  { %177 = vmatprep.subr.mxu0 %v79_v5  ;;  %v61_v10 = vld [vmem:[#allocation5 + $0x60] sm:$0xff]  ;;  %v60_v12 = vld [vmem:[#allocation5 + $0x58] sm:$0xff]  ;;  %v59_v14 = vld [vmem:[#allocation5 + $0x50] sm:$0xff] }
  0x1f   :  { %178 = vmatpush3.msra.mxu0 %v63_v6  ;;  %v74_v15 = vld [vmem:[#allocation5 + $0xc8] sm:$0xff]  ;;  %v73_v17 = vld [vmem:[#allocation5 + $0xc0] sm:$0xff]  ;;  %v72_v19 = vld [vmem:[#allocation5 + $0xb8] sm:$0xff]  ;;  %p270_p13 = por %p269_p12, %p268_p11 }
  0x20   :  { %179 = vmatprep.subr.mxu0 %v78_v7  ;;  %v58_v16 = vld [vmem:[#allocation5 + $0x48] sm:$0xff]  ;;  %v57_v18 = vld [vmem:[#allocation5 + $0x40] sm:$0xff]  ;;  %v56_v20 = vld [vmem:[#allocation5 + $0x38] sm:$0xff] }
  0x21   :  { %180 = vmatpush3.msra.mxu0 %v62_v8  ;;  %v71_v21 = vld [vmem:[#allocation5 + $0xb0] sm:$0xff]  ;;  %v70_v23 = vld [vmem:[#allocation5 + $0xa8] sm:$0xff]  ;;  %v69_v25 = vld [vmem:[#allocation5 + $0xa0] sm:$0xff]  ;;  %p271_p0 = pnand %p270_p13, %p264_p10 }
  0x22   :  { %181 = vmatprep.subr.mxu0 %v77_v9  ;;  %v55_v22 = vld [vmem:[#allocation5 + $0x30] sm:$0xff]  ;;  %v54_v24 = vld [vmem:[#allocation5 + $0x28] sm:$0xff]  ;;  %v53_v26 = vld [vmem:[#allocation5 + $0x20] sm:$0xff] }
  0x23   :  { %182 = vmatpush3.msra.mxu0 %v61_v10  ;;  %v68_v27 = vld [vmem:[#allocation5 + $0x98] sm:$0xff]  ;;  %v67_v29 = vld [vmem:[#allocation5 + $0x90] sm:$0xff]  ;;  %v66_v31 = vld [vmem:[#allocation5 + $0x88] sm:$0xff] }
  0x24   :  { %183 = vmatprep.subr.mxu0 %v76_v11  ;;  %v52_v28 = vld [vmem:[#allocation5 + $0x18] sm:$0xff]  ;;  %v51_v30 = vld [vmem:[#allocation5 + $0x10] sm:$0xff]  ;;  %v50_v32 = vld [vmem:[#allocation5 + $0x8] sm:$0xff] }
  0x25   :  { %184 = vmatpush3.msra.mxu0 %v60_v12  ;;  %v65_v33 = vld [vmem:[#allocation5 + $0x80] sm:$0xff] }
  0x26   :  { %185 = vmatprep.subr.mxu0 %v75_v13  ;;  %v49_v34 = vld [vmem:[#allocation5] sm:$0xff] }
  0x27   :  { %186 = vmatpush3.msra.mxu0 %v59_v14 }
  0x28   :  { %187 = vmatprep.subr.mxu0 %v74_v15 }
  0x29   :  { %188 = vmatpush3.msra.mxu0 %v58_v16 }
  0x2a   :  { %189 = vmatprep.subr.mxu0 %v73_v17 }
  0x2b   :  { %190 = vmatpush3.msra.mxu0 %v57_v18 }
  0x2c   :  { %191 = vmatprep.subr.mxu0 %v72_v19 }
  0x2d   :  { %192 = vmatpush3.msra.mxu0 %v56_v20 }
  0x2e   :  { %193 = vmatprep.subr.mxu0 %v71_v21 }
  0x2f   :  { %194 = vmatpush3.msra.mxu0 %v55_v22 }
  0x30   :  { %195 = vmatprep.subr.mxu0 %v70_v23 }
  0x31   :  { %196 = vmatpush3.msra.mxu0 %v54_v24 }
  0x32   :  { %197 = vmatprep.subr.mxu0 %v69_v25 }
  0x33   :  { %198 = vmatpush3.msra.mxu0 %v53_v26 }
  0x34   :  { %199 = vmatprep.subr.mxu0 %v68_v27 }
  0x35   :  { %200 = vmatpush3.msra.mxu0 %v52_v28 }
  0x36   :  { %201 = vmatprep.subr.mxu0 %v67_v29 }
  0x37   :  { %202 = vmatpush3.msra.mxu0 %v51_v30 }
  0x38   :  { %203 = vmatprep.subr.mxu0 %v66_v31 }
  0x39   :  { %204 = vmatpush3.msra.mxu0 %v50_v32 }
  0x3a   :  { %205 = vmatprep.subr.mxu0 %v65_v33 }
  0x3b   :  { %206 = vmatpush3.msra.mxu0 %v49_v34 }
  0xa6   :  { %v42_v35 = vpop.xlane.xlu0 %41 }
  0xa7   :  { %v43_v36 = vsub.f32 %v316_v0, %v42_v35  ;;  %v44_v37 = vsub.f32 %v318_v1, %v42_v35 }
  0xa9   :  { %v45_v38 = vmul.f32 1.442695, %v43_v36  ;;  %v47_v39 = vmul.f32 1.442695, %v44_v37 }
  0xab   :  { %217 = vpow2.f32 %v45_v38 }
  0xac   :  { %219 = vpow2.f32 %v47_v39 }
  0xb8   :  { %v218_v40 = vpop.eup %217 }
  0xb9   :  { %v220_v41 = vpop.eup %219 }
  0xba   :  { %145 = vmatprep.mubr.f32.mxu0 %v220_v41 }
  0xbb   :  { %146 = vmatmul.mubr.f32.vlgmr.msra.gmra.mxu0 %v218_v40 }
 0x17b   :  { %v207_v43 = vpop.f32.mrf.mxu0 }
 0x17d   :  { %v208_v44 = vpop.f32.mrf.mxu0 }
 0x17e   :  { %v209_v45 = vadd.f32 %v208_v44, %v207_v43 }
 0x180   :  { %221 = vrcp.f32 %v209_v45 }
 0x18d   :  { %v222_v46 = vpop.eup %221 }
 0x18e   :  { %154 = vperm.xlu0 %216, %v222_v46  }
 0x209   :  { %v155_v47 = vpop.permute.xlu0 %154 }
 0x20a   :  { %v157_v48 = vmul.f32 %v209_v45, %v155_v47 }
 0x20c   :  { %158 = vst [vmem:[#allocation7] sm:$0xff] %v157_v48 }
 0x20d   :  { %274 = shalt.err (!%p271_p0)
}
 0x20e   :  { %168 = dma.vmem_to_hbm [thread:$0]  %s166_s1, 128, %s329_s2, [#allocation4]  }
 0x20f   :  { %287 = dma.done.wait [#allocation4], 128  }
 0x210   :  { %288 = vsyncadd [#allocation4], 4294967168 }
 0x211   :  { %172 = vsyncpa [#allocation3], 1 }
 0x212   :  { %173 = vsyncpa [#allocation6], 1 }
 0x213   :  { %174 = vsyncpa [#allocation4], 1 }

</bundles_post_ra>
